<compile_context>
chip_gen: v7x
topology: tpu7x:2x2x1
jax: 0.10.0
libtpu: 0.0.40
codegen_flags: <defaults>
</compile_context>

<pallas_src>
import functools

import jax
import jax.numpy as jnp
from jax import lax
from jax.experimental import pallas as pl
from jax.experimental.pallas import tpu as pltpu


_SMEM = pltpu.MemorySpace.SMEM
_VMEM_LIMIT = 32 * 1024 * 1024  # conservative scoped-VMEM budget (fits v5e/v6e/v7x)


def _choose_row_block(total_rows: int, vocab: int,
                      target_bytes: int = 2 * 1024 * 1024) -> int:
    """Row tile so one (rows, vocab) f32 block is ~<=2 MiB (v7x-safe), multiple of 8."""
    rows = max(8, (target_bytes // (4 * vocab)) // 8 * 8)
    rows = min(rows, 512)
    if total_rows <= rows:
        return total_rows          # full-dim block is always a legal block shape
    return rows


# ----------------------------------------------------------------------------
# Kernel 1: loss_skd = l2_loss(softmax(student_ctc/tau), softmax(teacher_ctc/tau))
#           = sum((s - t)^2) / B      (row-tiled streaming reduction)
# ----------------------------------------------------------------------------
def _skd_kernel(t_ref, s_ref, out_ref, *, tau, inv_batch, block_rows, total_rows):
    i = pl.program_id(0)

    @pl.when(i == 0)
    def _init():
        out_ref[0, 0] = jnp.float32(0.0)

    t = t_ref[...].astype(jnp.float32)
    s = s_ref[...].astype(jnp.float32)
    row = lax.broadcasted_iota(jnp.int32, t.shape, 0) + i * block_rows
    valid = row < total_rows                       # mask padded rows of last block

    def softmax(x):
        x = jnp.where(valid, x, 0.0)               # neutralize garbage rows
        m = jnp.max(x, axis=-1, keepdims=True)
        e = jnp.exp(x - m)
        inv = pl.reciprocal(jnp.sum(e, axis=-1, keepdims=True), approx=True)
        return e * inv

    d = softmax(s * (1.0 / tau)) - softmax(t * (1.0 / tau))
    d = jnp.where(valid, d, 0.0)
    out_ref[0, 0] += jnp.sum(d * d) * inv_batch


def skd_l2_loss(teacher_ctc_logit, student_ctc_logit, tau):
    b = teacher_ctc_logit.shape[0]
    v = teacher_ctc_logit.shape[-1]
    t2 = teacher_ctc_logit.reshape(-1, v)
    s2 = student_ctc_logit.reshape(-1, v)
    n = t2.shape[0]
    br = _choose_row_block(n, v)
    grid = (pl.cdiv(n, br),)
    kern = functools.partial(_skd_kernel, tau=float(tau), inv_batch=1.0 / float(b),
                             block_rows=br, total_rows=n)
    cost = pl.CostEstimate(
        flops=int(10 * n * v),
        transcendentals=int(2 * n * v),
        bytes_accessed=int(t2.size * t2.dtype.itemsize
                           + s2.size * s2.dtype.itemsize + 4))
    out = pl.pallas_call(
        kern,
        grid=grid,
        in_specs=[pl.BlockSpec((br, v), lambda i: (i, 0)),
                  pl.BlockSpec((br, v), lambda i: (i, 0))],
        out_specs=pl.BlockSpec((1, 1), lambda i: (0, 0), memory_space=_SMEM),
        out_shape=jax.ShapeDtypeStruct((1, 1), jnp.float32),
        compiler_params=pltpu.CompilerParams(
            # scalar accumulator across the grid axis => must be "arbitrary"
            dimension_semantics=("arbitrary",),
            vmem_limit_bytes=_VMEM_LIMIT),
        cost_estimate=cost,
    )(t2, s2)
    return out[0, 0]


# ----------------------------------------------------------------------------
# Kernel 2: loss_attention_logit
#   teacher_pred = selection_top_k_softmax(teacher_attention_logit)
#     (keep top-k logits, others -> -600, /attention_temperature, softmax)
#   student_pred = softmax(student_attention_logit)
#   loss = sum( teacher_pred * (log teacher_pred - log student_pred) ) / B
# ----------------------------------------------------------------------------
def _attn_kl_kernel(t_ref, s_ref, out_ref, *, top_k, attn_temp, inv_batch,
                    block_rows, total_rows):
    i = pl.program_id(0)

    @pl.when(i == 0)
    def _init():
        out_ref[0, 0] = jnp.float32(0.0)

    t = t_ref[...].astype(jnp.float32)
    s = s_ref[...].astype(jnp.float32)
    row = lax.broadcasted_iota(jnp.int32, t.shape, 0) + i * block_rows
    valid = row < total_rows
    t = jnp.where(valid, t, 0.0)
    s = jnp.where(valid, s, 0.0)

    # k-th largest value per row via iterative masking (top_k small & static).
    # TODO(synk): exact logit ties at the k-th value keep >k entries, unlike torch.topk.
    neg = jnp.finfo(jnp.float32).min
    work = t
    kth = jnp.max(work, axis=-1, keepdims=True)
    for _ in range(top_k - 1):
        work = jnp.where(work >= kth, neg, work)
        kth = jnp.max(work, axis=-1, keepdims=True)

    mod = jnp.where(t >= kth, t, -600.0) * (1.0 / attn_temp)

    def log_softmax(x):
        m = jnp.max(x, axis=-1, keepdims=True)
        z = x - m
        return z - jnp.log(jnp.sum(jnp.exp(z), axis=-1, keepdims=True))

    log_t = log_softmax(mod)
    log_s = log_softmax(s)
    kl = jnp.exp(log_t) * (log_t - log_s)
    kl = jnp.where(valid, kl, 0.0)
    out_ref[0, 0] += jnp.sum(kl) * inv_batch


def attention_kl_loss(teacher_att_logit, student_att_logit, top_k, attn_temp):
    b = teacher_att_logit.shape[0]
    v = teacher_att_logit.shape[-1]
    t2 = teacher_att_logit.reshape(-1, v)
    s2 = student_att_logit.reshape(-1, v)
    n = t2.shape[0]
    br = _choose_row_block(n, v)
    grid = (pl.cdiv(n, br),)
    kern = functools.partial(
        _attn_kl_kernel, top_k=int(top_k), attn_temp=float(attn_temp),
        inv_batch=1.0 / float(b), block_rows=br, total_rows=n)
    cost = pl.CostEstimate(
        flops=int((12 + 3 * top_k) * n * v),
        transcendentals=int(3 * n * v),
        bytes_accessed=int(t2.size * t2.dtype.itemsize
                           + s2.size * s2.dtype.itemsize + 4))
    out = pl.pallas_call(
        kern,
        grid=grid,
        in_specs=[pl.BlockSpec((br, v), lambda i: (i, 0)),
                  pl.BlockSpec((br, v), lambda i: (i, 0))],
        out_specs=pl.BlockSpec((1, 1), lambda i: (0, 0), memory_space=_SMEM),
        out_shape=jax.ShapeDtypeStruct((1, 1), jnp.float32),
        compiler_params=pltpu.CompilerParams(
            dimension_semantics=("arbitrary",),
            vmem_limit_bytes=_VMEM_LIMIT),
        cost_estimate=cost,
    )(t2, s2)
    return out[0, 0]


# ----------------------------------------------------------------------------
# Kernel 3: condition_layer — single-layer unidirectional LSTM over hs (B,T,D),
#           take last timestep, Linear(H -> odim, no bias), cross-entropy + acc.
#   * hs streamed over a T-chunk grid; (h, c) persist in VMEM scratch.
#   * input projection hoisted out of the time loop (one matmul per gate/chunk).
#   * per-gate stacked weights -> lane-aligned gate math, no sub-128 lane slices.
# TODO(synk): nn.LSTM dropout=0.1 acts only *between* layers; with
#             condition_layers=1 it is a no-op, so it is omitted here.
# ----------------------------------------------------------------------------
def _condition_kernel(hs_ref, wih_ref, whh_ref, b_ref, wout_ref, tgt_ref,
                      loss_ref, acc_ref, h_ref, c_ref, gx_ref, *,
                      hidden, t_chunk, total_t, inv_batch, odim):
    i = pl.program_id(0)
    nb = pl.num_programs(0)

    @pl.when(i == 0)
    def _init():
        h_ref[...] = jnp.zeros_like(h_ref)
        c_ref[...] = jnp.zeros_like(c_ref)

    bsz = hs_ref.shape[0]
    d = hs_ref.shape[2]

    # Hoisted input projection: one (B*Tc, D) x (D, H) matmul per gate per chunk,
    # bias (bias_ih + bias_hh) folded in.  Gate order: i, f, g, o (PyTorch).
    hs2 = hs_ref[...].astype(jnp.float32).reshape(bsz * t_chunk, d)
    for k in range(4):
        gxk = (jnp.dot(hs2, wih_ref[k], preferred_element_type=jnp.float32)
               + b_ref[k])
        gx_ref[k] = gxk.reshape(bsz, t_chunk, hidden)

    chunk_start = i * t_chunk

    def step(t, carry):
        h, c = carry
        valid = (chunk_start + t) < total_t        # mask padded tail frames

        def gate(k):
            gxt = gx_ref[k, :, pl.ds(t, 1), :][:, 0, :]           # (B, H)
            return gxt + jnp.dot(h, whh_ref[k],
                                 preferred_element_type=jnp.float32)

        i_g = jax.nn.sigmoid(gate(0))
        f_g = jax.nn.sigmoid(gate(1))
        g_g = jnp.tanh(gate(2))
        o_g = jax.nn.sigmoid(gate(3))
        c_new = f_g * c + i_g * g_g
        h_new = o_g * jnp.tanh(c_new)
        h = jnp.where(valid, h_new, h)
        c = jnp.where(valid, c_new, c)
        return h, c

    h_fin, c_fin = lax.fori_loop(0, t_chunk, step, (h_ref[...], c_ref[...]))
    h_ref[...] = h_fin
    c_ref[...] = c_fin

    @pl.when(i == nb - 1)
    def _finalize():
        # Reference LSTM runs on the padded hs and takes y[:, -1, :], i.e. the
        # last *padded* frame (no packing) — same as using the final timestep here.
        logits = jnp.dot(h_ref[...], wout_ref[...],
                         preferred_element_type=jnp.float32)       # (B, odim)
        m = jnp.max(logits, axis=-1, keepdims=True)
        z = logits - m
        log_probs = z - jnp.log(jnp.sum(jnp.exp(z), axis=-1, keepdims=True))

        tgt = tgt_ref[...]                                         # (B, 1) int32
        col = lax.broadcasted_iota(jnp.int32, logits.shape, 1)
        tmask = col == tgt
        target_logp = jnp.sum(jnp.where(tmask, log_probs, 0.0), axis=-1)
        loss_ref[0, 0] = -jnp.sum(target_logp) * inv_batch

        # argmax with first-index tie-breaking (matches torch.argmax).
        first_max = jnp.min(jnp.where(logits >= m, col, odim),
                            axis=-1, keepdims=True)
        correct = (first_max == tgt).astype(jnp.float32)
        acc_ref[0, 0] = jnp.sum(correct) * inv_batch


def condition_layer_forward(hs, speak_ids, params, hidden_dim, odim):
    b, t, d = hs.shape
    h = int(hidden_dim)
    odim = int(odim)
    t_chunk = t if t <= 128 else 128
    grid = (pl.cdiv(t, t_chunk),)
    tgt = speak_ids.astype(jnp.int32).reshape(b, 1)

    kern = functools.partial(_condition_kernel, hidden=h, t_chunk=t_chunk,
                             total_t=t, inv_batch=1.0 / float(b), odim=odim)
    cost = pl.CostEstimate(
        flops=int(8 * b * t * h * (d + h) + 2 * b * h * odim),
        transcendentals=int(5 * b * t * h + b * odim),
        bytes_accessed=int(hs.size * hs.dtype.itemsize
                           + (4 * d * h + 4 * h * h + 4 * h + h * odim) * 4
                           + b * 4 + 8))

    loss, acc = pl.pallas_call(
        kern,
        grid=grid,
        in_specs=[
            pl.BlockSpec((b, t_chunk, d), lambda i: (0, i, 0)),     # hs chunks
            pl.BlockSpec((4, d, h), lambda i: (0, 0, 0)),           # w_ih (per gate)
            pl.BlockSpec((4, h, h), lambda i: (0, 0, 0)),           # w_hh (per gate)
            pl.BlockSpec((4, 1, h), lambda i: (0, 0, 0)),           # bias (per gate)
            pl.BlockSpec((h, odim), lambda i: (0, 0)),              # output proj
            pl.BlockSpec((b, 1), lambda i: (0, 0)),                 # speak ids
        ],
        out_specs=(
            pl.BlockSpec((1, 1), lambda i: (0, 0), memory_space=_SMEM),
            pl.BlockSpec((1, 1), lambda i: (0, 0), memory_space=_SMEM),
        ),
        out_shape=(
            jax.ShapeDtypeStruct((1, 1), jnp.float32),
            jax.ShapeDtypeStruct((1, 1), jnp.float32),
        ),
        scratch_shapes=[
            pltpu.VMEM((b, h), jnp.float32),                        # h state
            pltpu.VMEM((b, h), jnp.float32),                        # c state
            pltpu.VMEM((4, b, t_chunk, h), jnp.float32),            # hoisted gx
        ],
        compiler_params=pltpu.CompilerParams(
            dimension_semantics=("arbitrary",),    # sequential recurrence over time
            vmem_limit_bytes=_VMEM_LIMIT),
        cost_estimate=cost,
    )(hs, params["w_ih"], params["w_hh"], params["bias"], params["w_out"], tgt)
    return loss[0, 0], acc[0, 0]


# ----------------------------------------------------------------------------
# Teacher_Student_Conformer (forward path only)
# ----------------------------------------------------------------------------
class TeacherStudentConformerForward:
    def __init__(self, *, student_adim, teacher_adim, tau, skd_weight, mtlalpha,
                 attention_logit_weight, top_k, attention_temperature,
                 use_condition_layer, condition_layers, condition_speak_id_nums,
                 condition_hidden_dim, condition_weight, start_condition_epoch,
                 no_condition_epoch, rng_key):
        self.teacher_adim = teacher_adim
        self.student_adim = student_adim
        self.tau = tau
        self.weight = skd_weight
        self.mtlalpha = mtlalpha
        self.attention_logit_weight = attention_logit_weight
        self.top_k = top_k
        self.attention_temperature = attention_temperature
        self.condition_weight = condition_weight if use_condition_layer else 0.0
        self.start_condition_epoch = start_condition_epoch
        self.stop_condition_epoch = start_condition_epoch + no_condition_epoch
        self.use_condition_layer = use_condition_layer

        keys = jax.random.split(rng_key, 6)
        if use_condition_layer:
            h = condition_hidden_dim
            d = student_adim
            o = condition_speak_id_nums
            assert condition_layers == 1  # see TODO(synk) on dropout above
            # PyTorch shapes: w_ih (4H, D), w_hh (4H, H), biases (4H,), linear (O, H),
            # gate order i,f,g,o.  Stored here stacked per gate and pre-transposed:
            #   w_ih[k] = w_ih_torch[kH:(k+1)H, :].T ; bias[k] = (b_ih + b_hh)[kH:(k+1)H].
            self.cond_params = {
                "w_ih": (0.1 * jax.random.normal(keys[0], (4, d, h))).astype(jnp.float32),
                "w_hh": (0.1 * jax.random.normal(keys[1], (4, h, h))).astype(jnp.float32),
                "bias": (0.1 * jax.random.normal(keys[2], (4, 1, h))).astype(jnp.float32),
                "w_out": (0.1 * jax.random.normal(keys[3], (h, o))).astype(jnp.float32),
            }
            self.condition_hidden_dim = h
            self.condition_odim = o
        else:
            self.cond_params = None
        # Conv1d(student_adim -> teacher_adim, k=1) is only used in RKD_train,
        # not in forward(); parameters initialized for parity but unused here.
        self.conv_w = (0.1 * jax.random.normal(
            keys[4], (teacher_adim, student_adim))).astype(jnp.float32)
        self.conv_b = jnp.zeros((teacher_adim,), jnp.float32)

    def forward(self, model_outputs, speak_ids=None, epochs=0):
        """model_outputs holds what the (external) E2E teacher/student produced."""
        loss = model_outputs["student_loss"]
        acc = model_outputs["student_acc"]
        loss_att = model_outputs["student_loss_att"]
        loss_ctc = model_outputs["student_loss_ctc"]

        loss_attention_logit = attention_kl_loss(
            model_outputs["teacher_attention_logit"],
            model_outputs["student_attention_logit"],
            self.top_k, self.attention_temperature)

        loss_skd = skd_l2_loss(
            model_outputs["teacher_ctc_logit"],
            model_outputs["student_ctc_logit"],
            self.tau)

        loss_att_sum = ((1.0 - self.attention_logit_weight) * loss_att
                        + self.attention_logit_weight * loss_attention_logit)

        hs = model_outputs["student_hs_pad"]
        if (self.use_condition_layer
                and epochs >= self.start_condition_epoch
                and epochs <= self.stop_condition_epoch):
            loss_condition, condition_acc = condition_layer_forward(
                hs, speak_ids, self.cond_params,
                self.condition_hidden_dim, self.condition_odim)
        else:
            loss_condition = jnp.float32(0.0)
            condition_acc = 0.0

        loss_sum = ((1.0 - self.mtlalpha) * loss_att_sum
                    + self.mtlalpha * loss_ctc
                    + self.weight * loss_skd
                    - self.condition_weight * loss_condition)

        return (loss, loss_att_sum, loss_attention_logit, loss_skd,
                loss_condition, loss_sum, acc, condition_acc)


if __name__ == "__main__":
    # Small deterministic shapes consistent with the module.
    B, T_enc, L_dec, V = 2, 8, 8, 128          # batch, enc frames, dec steps, vocab
    student_adim = 32
    teacher_adim = 48
    speak_id_nums = 16

    key = jax.random.PRNGKey(0)
    ks = jax.random.split(key, 10)

    model_outputs = {
        # ctc.ys_hat of teacher / student: (B, T, V)
        "teacher_ctc_logit": jax.random.normal(ks[0], (B, T_enc, V), jnp.float32),
        "student_ctc_logit": jax.random.normal(ks[1], (B, T_enc, V), jnp.float32),
        # pred_pad (attention decoder logits): (B, L, V)
        "teacher_attention_logit": jax.random.normal(ks[2], (B, L_dec, V), jnp.float32),
        "student_attention_logit": jax.random.normal(ks[3], (B, L_dec, V), jnp.float32),
        # student encoder hs_pad: (B, T, student_adim)
        "student_hs_pad": jax.random.normal(ks[4], (B, T_enc, student_adim), jnp.float32),
        # scalar stand-ins for the student E2E's own losses / accuracy
        "student_loss": jnp.float32(1.7),
        "student_acc": 0.5,
        "student_loss_att": jnp.float32(1.2),
        "student_loss_ctc": jnp.float32(2.3),
    }
    speak_ids = jax.random.randint(ks[5], (B,), 0, speak_id_nums, jnp.int32)

    model = TeacherStudentConformerForward(
        student_adim=student_adim, teacher_adim=teacher_adim,
        tau=2.0, skd_weight=1.0, mtlalpha=0.3, attention_logit_weight=0.5,
        top_k=4, attention_temperature=2.0,
        use_condition_layer=True, condition_layers=1,
        condition_speak_id_nums=speak_id_nums, condition_hidden_dim=32,
        condition_weight=0.1, start_condition_epoch=0, no_condition_epoch=10,
        rng_key=ks[6])

    outs = model.forward(model_outputs, speak_ids=speak_ids, epochs=0)
    outs = jax.block_until_ready(
        [o for o in outs if isinstance(o, jnp.ndarray)])
    print("KERNEL_OK")
</pallas_src>

<mosaic_0001>
module attributes {stable_mosaic.version = 11 : i64} {
  func.func @_attn_kl_kernel(%arg0: i32, %arg1: memref<16x128xf32, #tpu.memory_space<vmem>>, %arg2: memref<16x128xf32, #tpu.memory_space<vmem>>, %arg3: memref<1x1xf32, #tpu.memory_space<smem>>) attributes {dimension_semantics = [#tpu.dimension_semantics<arbitrary>], iteration_bounds = array<i64: 1>, scalar_prefetch = 0 : i64, scratch_operands = 0 : i64, tpu.core_type = #tpu.core_type<tc>, window_params = [{transform_indices = @transform_0, window_bounds = array<i64: 16, 128>}, {transform_indices = @transform_1, window_bounds = array<i64: 16, 128>}, {transform_indices = @transform_2, window_bounds = array<i64: 1, 1>}]} {
    %c0_i32 = arith.constant 0 : i32
    %0 = arith.cmpi eq, %arg0, %c0_i32 : i32
    %1 = arith.extui %0 : i1 to i32
    %c0_i32_0 = arith.constant 0 : i32
    %2 = arith.cmpi ne, %1, %c0_i32_0 : i32
    scf.if %2 {
      %cst_26 = arith.constant 0.000000e+00 : f32
      %c0_27 = arith.constant 0 : index
      %c0_28 = arith.constant 0 : index
      %74 = memref.load %arg3[%c0_27, %c0_28] : memref<1x1xf32, #tpu.memory_space<smem>>
      memref.store %cst_26, %arg3[%c0_27, %c0_28] : memref<1x1xf32, #tpu.memory_space<smem>>
    } else {
    }
    %c0 = arith.constant 0 : index
    %c0_1 = arith.constant 0 : index
    %3 = vector.load %arg1[%c0, %c0_1] : memref<16x128xf32, #tpu.memory_space<vmem>>, vector<16x128xf32>
    %c0_2 = arith.constant 0 : index
    %c0_3 = arith.constant 0 : index
    %4 = vector.load %arg2[%c0_2, %c0_3] : memref<16x128xf32, #tpu.memory_space<vmem>>, vector<16x128xf32>
    %5 = tpu.iota {dimensions = array<i32: 0>} : vector<16x128xi32>
    %c16_i32 = arith.constant 16 : i32
    %6 = arith.muli %arg0, %c16_i32 : i32
    %7 = vector.broadcast %6 : i32 to vector<16x128xi32>
    %8 = arith.addi %5, %7 : vector<16x128xi32>
    %c16_i32_4 = arith.constant 16 : i32
    %9 = vector.broadcast %c16_i32_4 : i32 to vector<16x128xi32>
    %10 = arith.cmpi slt, %8, %9 : vector<16x128xi32>
    %cst = arith.constant 0.000000e+00 : f32
    %11 = vector.broadcast %cst : f32 to vector<16x128xf32>
    %12 = arith.select %10, %3, %11 : vector<16x128xi1>, vector<16x128xf32>
    %cst_5 = arith.constant 0.000000e+00 : f32
    %13 = vector.broadcast %cst_5 : f32 to vector<16x128xf32>
    %14 = arith.select %10, %4, %13 : vector<16x128xi1>, vector<16x128xf32>
    %cst_6 = arith.constant dense<0xFF800000> : vector<16xf32>
    %15 = vector.multi_reduction <maximumf>, %12, %cst_6 [1] : vector<16x128xf32> to vector<16xf32>
    %16 = vector.shape_cast %15 : vector<16xf32> to vector<16x1xf32>
    %17 = vector.broadcast %16 : vector<16x1xf32> to vector<16x128xf32>
    %18 = arith.cmpf oge, %12, %17 : vector<16x128xf32>
    %cst_7 = arith.constant -3.40282347E+38 : f32
    %19 = vector.broadcast %cst_7 : f32 to vector<16x128xf32>
    %20 = arith.select %18, %19, %12 : vector<16x128xi1>, vector<16x128xf32>
    %cst_8 = arith.constant dense<0xFF800000> : vector<16xf32>
    %21 = vector.multi_reduction <maximumf>, %20, %cst_8 [1] : vector<16x128xf32> to vector<16xf32>
    %22 = vector.shape_cast %21 : vector<16xf32> to vector<16x1xf32>
    %23 = vector.broadcast %22 : vector<16x1xf32> to vector<16x128xf32>
    %24 = arith.cmpf oge, %20, %23 : vector<16x128xf32>
    %cst_9 = arith.constant -3.40282347E+38 : f32
    %25 = vector.broadcast %cst_9 : f32 to vector<16x128xf32>
    %26 = arith.select %24, %25, %20 : vector<16x128xi1>, vector<16x128xf32>
    %cst_10 = arith.constant dense<0xFF800000> : vector<16xf32>
    %27 = vector.multi_reduction <maximumf>, %26, %cst_10 [1] : vector<16x128xf32> to vector<16xf32>
    %28 = vector.shape_cast %27 : vector<16xf32> to vector<16x1xf32>
    %29 = vector.broadcast %28 : vector<16x1xf32> to vector<16x128xf32>
    %30 = arith.cmpf oge, %26, %29 : vector<16x128xf32>
    %cst_11 = arith.constant -3.40282347E+38 : f32
    %31 = vector.broadcast %cst_11 : f32 to vector<16x128xf32>
    %32 = arith.select %30, %31, %26 : vector<16x128xi1>, vector<16x128xf32>
    %cst_12 = arith.constant dense<0xFF800000> : vector<16xf32>
    %33 = vector.multi_reduction <maximumf>, %32, %cst_12 [1] : vector<16x128xf32> to vector<16xf32>
    %34 = vector.shape_cast %33 : vector<16xf32> to vector<16x1xf32>
    %35 = vector.broadcast %34 : vector<16x1xf32> to vector<16x128xf32>
    %36 = arith.cmpf oge, %12, %35 : vector<16x128xf32>
    %cst_13 = arith.constant -6.000000e+02 : f32
    %37 = vector.broadcast %cst_13 : f32 to vector<16x128xf32>
    %38 = arith.select %36, %12, %37 : vector<16x128xi1>, vector<16x128xf32>
    %cst_14 = arith.constant 5.000000e-01 : f32
    %39 = vector.broadcast %cst_14 : f32 to vector<16x128xf32>
    %40 = arith.mulf %38, %39 : vector<16x128xf32>
    %cst_15 = arith.constant dense<0xFF800000> : vector<16xf32>
    %41 = vector.multi_reduction <maximumf>, %40, %cst_15 [1] : vector<16x128xf32> to vector<16xf32>
    %42 = vector.shape_cast %41 : vector<16xf32> to vector<16x1xf32>
    %43 = vector.broadcast %42 : vector<16x1xf32> to vector<16x128xf32>
    %44 = arith.subf %40, %43 : vector<16x128xf32>
    %45 = math.exp %44 : vector<16x128xf32>
    %cst_16 = arith.constant dense<0.000000e+00> : vector<16xf32>
    %46 = vector.multi_reduction <add>, %45, %cst_16 [1] : vector<16x128xf32> to vector<16xf32>
    %47 = vector.shape_cast %46 : vector<16xf32> to vector<16x1xf32>
    %48 = math.log %47 : vector<16x1xf32>
    %49 = vector.broadcast %48 : vector<16x1xf32> to vector<16x128xf32>
    %50 = arith.subf %44, %49 : vector<16x128xf32>
    %cst_17 = arith.constant dense<0xFF800000> : vector<16xf32>
    %51 = vector.multi_reduction <maximumf>, %14, %cst_17 [1] : vector<16x128xf32> to vector<16xf32>
    %52 = vector.shape_cast %51 : vector<16xf32> to vector<16x1xf32>
    %53 = vector.broadcast %52 : vector<16x1xf32> to vector<16x128xf32>
    %54 = arith.subf %14, %53 : vector<16x128xf32>
    %55 = math.exp %54 : vector<16x128xf32>
    %cst_18 = arith.constant dense<0.000000e+00> : vector<16xf32>
    %56 = vector.multi_reduction <add>, %55, %cst_18 [1] : vector<16x128xf32> to vector<16xf32>
    %57 = vector.shape_cast %56 : vector<16xf32> to vector<16x1xf32>
    %58 = math.log %57 : vector<16x1xf32>
    %59 = vector.broadcast %58 : vector<16x1xf32> to vector<16x128xf32>
    %60 = arith.subf %54, %59 : vector<16x128xf32>
    %61 = math.exp %50 : vector<16x128xf32>
    %62 = arith.subf %50, %60 : vector<16x128xf32>
    %63 = arith.mulf %61, %62 : vector<16x128xf32>
    %cst_19 = arith.constant 0.000000e+00 : f32
    %64 = vector.broadcast %cst_19 : f32 to vector<16x128xf32>
    %65 = arith.select %10, %63, %64 : vector<16x128xi1>, vector<16x128xf32>
    %c0_20 = arith.constant 0 : index
    %c0_21 = arith.constant 0 : index
    %66 = memref.load %arg3[%c0_20, %c0_21] : memref<1x1xf32, #tpu.memory_space<smem>>
    %67 = vector.shape_cast %65 : vector<16x128xf32> to vector<1x16x128xf32>
    %cst_22 = arith.constant dense<0.000000e+00> : vector<1xf32>
    %68 = vector.multi_reduction <add>, %67, %cst_22 [1, 2] : vector<1x16x128xf32> to vector<1xf32>
    %69 = vector.shape_cast %68 : vector<1xf32> to vector<1x1x1xf32>
    %70 = vector.extract %69[0, 0, 0] : f32 from vector<1x1x1xf32>
    %cst_23 = arith.constant 5.000000e-01 : f32
    %71 = arith.mulf %70, %cst_23 : f32
    %72 = arith.addf %66, %71 : f32
    %c0_24 = arith.constant 0 : index
    %c0_25 = arith.constant 0 : index
    %73 = memref.load %arg3[%c0_24, %c0_25] : memref<1x1xf32, #tpu.memory_space<smem>>
    memref.store %72, %arg3[%c0_24, %c0_25] : memref<1x1xf32, #tpu.memory_space<smem>>
    return
  }
  func.func @transform_0(%arg0: i32) -> (i32, i32) {
    %c0_i32 = arith.constant 0 : i32
    %c0_i32_0 = arith.constant 0 : i32
    return %arg0, %c0_i32 : i32, i32
  }
  func.func @transform_1(%arg0: i32) -> (i32, i32) {
    %c0_i32 = arith.constant 0 : i32
    %c0_i32_0 = arith.constant 0 : i32
    return %arg0, %c0_i32 : i32, i32
  }
  func.func @transform_2(%arg0: i32) -> (i32, i32) {
    %c0_i32 = arith.constant 0 : i32
    %c0_i32_0 = arith.constant 0 : i32
    %c0_i32_1 = arith.constant 0 : i32
    return %c0_i32, %c0_i32_0 : i32, i32
  }
}

</mosaic_0001>

<bundles_post_ra>
// kernel: tpu_custom_call.1
= control target key start
LH: loop header
LB: loop body
LE: loop exit
PB: predicated region body
PF: predicated region fallthrough
CT: control target
= control target key end

     0   :  { %7 = vsyncpa [#allocation3], 0  ;;  %s321_s0 = inlined_call_operand.hbm [shape: f32[16,128], index: 0, kind: input, shape index: {}]   ;;  %s322_s1 = inlined_call_operand.hbm [shape: f32[16,128], index: 1, kind: input, shape index: {}]   ;;  %s323_s2 = inlined_call_operand.hbm [shape: f32[1,1], index: 2, kind: output, shape index: {}]  }
   0x1   :  { %8 = vsyncpa [#allocation6], 0 }
   0x2   :  { %9 = vsyncpa [#allocation4], 0  ;;  %s265_s9 = smov [#allocation2]   ;;  %s205_s13 = scalar_lea.hbm %s321_s0, 256 }
   0x3   :  { %s15_s10 = sshll.u32 %s265_s9, 4  ;;  %p206_p0 = scmp.ne.s32.totalorder %s321_s0, %s205_s13  ;;  %s16_s10 = int_to_ptr.vmem [resolvable:$true] %s15_s10 }
   0x4   :  { %p209_p1 = scmp.lt.u32.totalorder %s205_s13, %s321_s0 }
   0x6   :  { %p211_p2 = pnand %p209_p1, %p206_p0 }
   0x8   :  { %214 = shalt.err (!%p211_p2)
}
   0x9   :  { %s215_s18 = scalar_lea.vmem %s16_s10, 256  ;;  %p220_p4 = scmp.lt.s32.totalorder %s16_s10, %s16_s10 }
   0xa   :  { %p216_p3 = scmp.ne.s32.totalorder %s16_s10, %s215_s18  ;;  %p221_p5 = scmp.lt.s32.totalorder %s215_s18, %s215_s18 }
   0xc   :  { %p222_p6 = por %p221_p5, %p220_p4 }
   0xe   :  { %p223_p7 = pnand %p222_p6, %p216_p3 }
  0x10   :  { %226 = shalt.err (!%p223_p7)
}
  0x11   :  { %s266_s19 = smov 128   ;;  %s267_s20 = smov 8  }
  0x12   :  { %21 = dma.hbm_to_vmem [thread:$0]  %s321_s0, 256, %s16_s10, [#allocation3], %s266_s19, %s266_s19, %s267_s20  }
  0x13   :  { %s268_s23 = smov [#allocation5]   ;;  %s227_s27 = scalar_lea.hbm %s322_s1, 256 }
  0x14   :  { %s27_s24 = sshll.u32 %s268_s23, 4  ;;  %p228_p8 = scmp.ne.s32.totalorder %s322_s1, %s227_s27  ;;  %s28_s24 = int_to_ptr.vmem [resolvable:$true] %s27_s24 }
  0x15   :  { %p231_p9 = scmp.lt.u32.totalorder %s227_s27, %s322_s1 }
  0x17   :  { %p233_p10 = pnand %p231_p9, %p228_p8 }
  0x19   :  { %236 = shalt.err (!%p233_p10)
}
  0x1a   :  { %s237_s4 = scalar_lea.vmem %s28_s24, 256  ;;  %p242_p12 = scmp.lt.s32.totalorder %s28_s24, %s28_s24 }
  0x1b   :  { %p238_p11 = scmp.ne.s32.totalorder %s28_s24, %s237_s4  ;;  %p243_p13 = scmp.lt.s32.totalorder %s237_s4, %s237_s4 }
  0x1d   :  { %p244_p0 = por %p243_p13, %p242_p12 }
  0x1f   :  { %p245_p1 = pnand %p244_p0, %p238_p11 }
  0x21   :  { %248 = shalt.err (!%p245_p1)
}
  0x22   :  { %33 = dma.hbm_to_vmem [thread:$0]  %s322_s1, 256, %s28_s24, [#allocation6], %s266_s19, %s266_s19, %s267_s20  }
  0x23   :  { %259 = dma.done.wait [#allocation3], 256  }
  0x24   :  { %260 = vsyncadd [#allocation3], 4294967040 }
  0x25   :  { %261 = dma.done.wait [#allocation6], 256  }
  0x26   :  { %262 = vsyncadd [#allocation6], 4294967040  ;;  %v46_v0 = vld [vmem:[#allocation2] sm:$0xff]  ;;  %v47_v1 = vld [vmem:[#allocation2 + $0x8] sm:$0xff]  ;;  %s249_s9 = scalar_lea.hbm %s323_s2, 16 }
  0x27   :  { %63 = vmax.xlane.f32.xlu0 %v46_v0  ;;  %v48_v19 = vld [vmem:[#allocation5] sm:$0xff]  ;;  %v49_v21 = vld [vmem:[#allocation5 + $0x8] sm:$0xff]  ;;  %p250_p2 = scmp.ne.s32.totalorder %s323_s2, %s249_s9  ;;  %p253_p3 = scmp.lt.u32.totalorder %s249_s9, %s323_s2 }
  0x29   :  { %p255_p4 = pnand %p253_p3, %p250_p2 }
  0x2b   :  { %65 = vmax.xlane.f32.xlu0 %v47_v1 }
  0xb4   :  { %v64_v2 = vpop.xlane.xlu0 %63 }
  0xb5   :  { %vm67_vm0 = vcmp.ge.f32.partialorder %v46_v0, %v64_v2 }
  0xb6   :  { %v69_v3 = vsel %vm67_vm0, -3.4028235e+38, %v46_v0 }
  0xb7   :  { %71 = vmax.xlane.f32.xlu1 %v69_v3 }
  0xb8   :  { %v66_v4 = vpop.xlane.xlu0 %65 }
  0xb9   :  { %vm68_vm1 = vcmp.ge.f32.partialorder %v47_v1, %v66_v4 }
  0xba   :  { %v70_v5 = vsel %vm68_vm1, -3.4028235e+38, %v47_v1 }
  0xbb   :  { %73 = vmax.xlane.f32.xlu1 %v70_v5 }
 0x144   :  { %v72_v6 = vpop.xlane.xlu1 %71 }
 0x145   :  { %vm75_vm2 = vcmp.ge.f32.partialorder %v69_v3, %v72_v6 }
 0x146   :  { %v77_v7 = vsel %vm75_vm2, -3.4028235e+38, %v69_v3 }
 0x147   :  { %79 = vmax.xlane.f32.xlu0 %v77_v7 }
 0x148   :  { %v74_v8 = vpop.xlane.xlu1 %73 }
 0x149   :  { %vm76_vm3 = vcmp.ge.f32.partialorder %v70_v5, %v74_v8 }
 0x14a   :  { %v78_v9 = vsel %vm76_vm3, -3.4028235e+38, %v70_v5 }
 0x14b   :  { %81 = vmax.xlane.f32.xlu1 %v78_v9 }
 0x1d4   :  { %v80_v10 = vpop.xlane.xlu0 %79 }
 0x1d5   :  { %vm83_vm4 = vcmp.ge.f32.partialorder %v77_v7, %v80_v10 }
 0x1d6   :  { %v85_v11 = vsel %vm83_vm4, -3.4028235e+38, %v77_v7 }
 0x1d7   :  { %87 = vmax.xlane.f32.xlu0 %v85_v11 }
 0x1d8   :  { %v82_v12 = vpop.xlane.xlu1 %81 }
 0x1d9   :  { %vm84_vm5 = vcmp.ge.f32.partialorder %v78_v9, %v82_v12 }
 0x1da   :  { %v86_v13 = vsel %vm84_vm5, -3.4028235e+38, %v78_v9 }
 0x1db   :  { %89 = vmax.xlane.f32.xlu1 %v86_v13 }
 0x264   :  { %v88_v14 = vpop.xlane.xlu0 %87 }
 0x265   :  { %vm91_vm6 = vcmp.ge.f32.partialorder %v46_v0, %v88_v14 }
 0x266   :  { %v93_v15 = vsel %vm91_vm6, %v46_v0, -600.0 }
 0x267   :  { %v95_v16 = vmul.f32 0.5, %v93_v15 }
 0x268   :  { %v90_v17 = vpop.xlane.xlu1 %89 }
 0x269   :  { %vm92_vm7 = vcmp.ge.f32.partialorder %v47_v1, %v90_v17  ;;  %97 = vmax.xlane.f32.xlu0 %v95_v16 }
 0x26a   :  { %v94_v18 = vsel %vm92_vm7, %v47_v1, -600.0 }
 0x26b   :  { %v96_v20 = vmul.f32 0.5, %v94_v18 }
 0x26d   :  { %99 = vmax.xlane.f32.xlu1 %v96_v20  ;;  %117 = vmax.xlane.f32.xlu0 %v48_v19 }
 0x271   :  { %119 = vmax.xlane.f32.xlu1 %v49_v21 }
 0x2f6   :  { %v98_v22 = vpop.xlane.xlu0 %97 }
 0x2f7   :  { %v101_v23 = vsub.f32 %v95_v16, %v98_v22 }
 0x2f9   :  { %v103_v24 = vmul.f32 1.442695, %v101_v23 }
 0x2fa   :  { %v100_v25 = vpop.xlane.xlu1 %99  ;;  %v118_v26 = vpop.xlane.xlu0 %117 }
 0x2fb   :  { %185 = vpow2.f32 %v103_v24  ;;  %v102_v27 = vsub.f32 %v96_v20, %v100_v25  ;;  %v121_v28 = vsub.f32 %v48_v19, %v118_v26 }
 0x2fd   :  { %v105_v29 = vmul.f32 1.442695, %v102_v27  ;;  %v123_v30 = vmul.f32 1.442695, %v121_v28 }
 0x2fe   :  { %v120_v31 = vpop.xlane.xlu1 %119 }
 0x2ff   :  { %187 = vpow2.f32 %v105_v29  ;;  %v122_v32 = vsub.f32 %v49_v21, %v120_v31 }
 0x300   :  { %189 = vpow2.f32 %v123_v30 }
 0x301   :  { %v125_v33 = vmul.f32 1.442695, %v122_v32 }
 0x303   :  { %191 = vpow2.f32 %v125_v33 }
 0x305   :  { %v186_v34 = vpop.eup %185 }
 0x306   :  { %107 = vadd.xlane.f32.xlu0 %v186_v34 }
 0x309   :  { %v188_v35 = vpop.eup %187 }
 0x30a   :  { %v190_v36 = vpop.eup %189  ;;  %109 = vadd.xlane.f32.xlu1 %v188_v35 }
 0x30b   :  { %127 = vadd.xlane.f32.xlu0 %v190_v36 }
 0x30d   :  { %v192_v37 = vpop.eup %191 }
 0x30e   :  { %129 = vadd.xlane.f32.xlu1 %v192_v37 }
 0x393   :  { %v108_v38 = vpop.xlane.xlu0 %107 }
 0x394   :  { %193 = vlog2.f32 %v108_v38 }
 0x397   :  { %v110_v39 = vpop.xlane.xlu1 %109 }
 0x398   :  { %195 = vlog2.f32 %v110_v39  ;;  %v128_v40 = vpop.xlane.xlu0 %127 }
 0x399   :  { %197 = vlog2.f32 %v128_v40 }
 0x39b   :  { %v130_v41 = vpop.xlane.xlu1 %129 }
 0x39c   :  { %199 = vlog2.f32 %v130_v41 }
 0x39e   :  { %v194_v42 = vpop.eup %193 }
 0x39f   :  { %v112_v43 = vmul.f32 0.6931472, %v194_v42 }
 0x3a1   :  { %v115_v44 = vsub.f32 %v101_v23, %v112_v43 }
 0x3a2   :  { %v196_v45 = vpop.eup %195 }
 0x3a3   :  { %v137_v46 = vmul.f32 1.442695, %v115_v44  ;;  %v114_v47 = vmul.f32 0.6931472, %v196_v45  ;;  %v198_v49 = vpop.eup %197 }
 0x3a4   :  { %v132_v52 = vmul.f32 0.6931472, %v198_v49 }
 0x3a5   :  { %v116_v48 = vsub.f32 %v102_v27, %v114_v47  ;;  %201 = vpow2.f32 %v137_v46 }
 0x3a6   :  { %v200_v50 = vpop.eup %199  ;;  %v135_v54 = vsub.f32 %v121_v28, %v132_v52 }
 0x3a7   :  { %v139_v51 = vmul.f32 1.442695, %v116_v48  ;;  %v134_v53 = vmul.f32 0.6931472, %v200_v50 }
 0x3a8   :  { %v141_v57 = vsub.f32 %v115_v44, %v135_v54 }
 0x3a9   :  { %203 = vpow2.f32 %v139_v51  ;;  %v136_v55 = vsub.f32 %v122_v32, %v134_v53 }
 0x3ab   :  { %v142_v58 = vsub.f32 %v116_v48, %v136_v55 }
 0x3af   :  { %v202_v56 = vpop.eup %201 }
 0x3b0   :  { %v143_v60 = vmul.f32 %v202_v56, %v141_v57 }
 0x3b3   :  { %v204_v59 = vpop.eup %203 }
 0x3b4   :  { %v144_v61 = vmul.f32 %v204_v59, %v142_v58 }
 0x3b6   :  { %v148_v62 = vadd.f32 %v144_v61, %v143_v60 }
 0x3b8   :  { %149 = vadd.xlane.f32.xlu0 %v148_v62 }
 0x445   :  { %v150_v63 = vpop.xlane.xlu0 %149 }
 0x446   :  { %v151_v0 = vrot.slane %v150_v63, 4 }
 0x448   :  { %v152_v1 = vadd.f32 %v151_v0, %v150_v63 }
 0x44a   :  { %v153_v2 = vrot.slane %v152_v1, 2 }
 0x44c   :  { %v154_v3 = vadd.f32 %v153_v2, %v152_v1 }
 0x44e   :  { %v155_v4 = vrot.slane %v154_v3, 1 }
 0x450   :  { %v156_v5 = vadd.f32 %v155_v4, %v154_v3 }
 0x452   :  { %177 = vpush %v156_v5 }
 0x483   :  { %s178_s1 = spop %177 }
 0x484   :  { %s158_s6 = smul.f32 0.5, %s178_s1 }
 0x486   :  { %161 = sst [smem:[#allocation7]] %s158_s6 }
 0x487   :  { %258 = shalt.err (!%p255_p4)
}
 0x488   :  { %s269_s14 = smov [#allocation7]  }
 0x489   :  { %169 = dma.smem_to_hbm %s269_s14, 16, %s323_s2, [#allocation4]  }
 0x48a   :  { %263 = dma.done.wait [#allocation4], 16  }
 0x48b   :  { %264 = vsyncadd [#allocation4], 4294967280 }
 0x48c   :  { %173 = sfence }
 0x48d   :  { %174 = vsyncpa [#allocation3], 1 }
 0x48e   :  { %175 = vsyncpa [#allocation6], 1 }
 0x48f   :  { %176 = vsyncpa [#allocation4], 1 }

</bundles_post_ra>
